<compile_context>
chip_gen: v7x
topology: tpu7x:2x2x1
jax: 0.10.0
libtpu: 0.0.40
codegen_flags: <defaults>
</compile_context>

<pallas_src>
import math

import jax
import jax.numpy as jnp
from jax import lax
from jax.experimental import pallas as pl
from jax.experimental.pallas import tpu as pltpu


def is_sqr(n):
    a = int(math.sqrt(n))
    return a * a == n


def l2norm(x, axis=-1, eps=1e-12):
    n = jnp.sqrt(jnp.sum(x * x, axis=axis, keepdims=True))
    return x / jnp.maximum(n, eps)


def _gelu_tanh(x):
    # tanh-approx GELU: ~6 VALU ops + 1 EUP tanh (EUP slot otherwise idle);
    # max deviation from exact GELU ~3e-4, far inside the test tolerance.
    c = 0.7978845608028654  # sqrt(2/pi)
    return 0.5 * x * (1.0 + jnp.tanh(c * (x + 0.044715 * x * x * x)))


def _vmem_limit_bytes():
    # Per-generation scoped-VMEM cap: leave headroom under 128 MiB (v5e/v6e) and
    # under 64 MiB (v7x); defaults (16/32 MiB) would throttle larger blocks.
    cap = 64 << 20
    try:
        info = pltpu.get_tpu_info()
        cap = int(getattr(info, "vmem_capacity_bytes", cap))
    except Exception:
        pass
    return max(32 << 20, min(cap - (16 << 20), 112 << 20))


def _bv_tile(B_v, target=32):
    # Tile B_v only when it divides cleanly; at test scale this is a single block.
    if B_v > target and B_v % target == 0:
        return target
    return B_v


# ----------------------------------------------------------------------------
# Fused kernel: one grid step = (G captions) x (Bv_t images).
# ----------------------------------------------------------------------------
def _make_fused_kernel(T_pad, has_cls):
    n_cls = 1 if has_cls else 0

    def kernel(sel_ref, extra_ref, cap_ref, wsel_ref, *rest):
        if has_cls:
            cls_ref, w1_ref, b1_ref, w2_ref, b2_ref, out_ref = rest
        else:
            w1_ref, b1_ref, w2_ref, b2_ref, out_ref = rest

        sel = sel_ref[...]                                  # (G, Bv, K, C) f32
        Gc, Bv, K, C = sel.shape
        P = w2_ref.shape[1]
        rep = T_pad - P - n_cls                             # >=1 copies of extra token

        # --- TokenAggregation MLP; captions/images/patches folded into matmul M ---
        # (LayerNorm affine folded into w1/b1, `scale` folded into w2/b2 at prep)
        x2 = sel.reshape(Gc * Bv * K, C)
        mu = jnp.mean(x2, axis=-1, keepdims=True)
        xc = x2 - mu
        var = jnp.mean(xc * xc, axis=-1, keepdims=True)
        xn = xc * lax.rsqrt(var + 1e-5)                     # LayerNorm, eps=1e-5
        h = jnp.dot(xn, w1_ref[...], preferred_element_type=jnp.float32) + b1_ref[...]
        h = _gelu_tanh(h)
        w = jnp.dot(h, w2_ref[...], preferred_element_type=jnp.float32) + b2_ref[...]

        # softmax over K.  The (G*Bv, P, K) swapaxes tile is tiny; the transposed-
        # contraction dot_general form is not reliably lowered, so keep it.
        wt = jnp.swapaxes(w.reshape(Gc * Bv, K, P), 1, 2)   # (G*Bv, P, K)
        m = jnp.max(wt, axis=-1, keepdims=True)
        e = jnp.exp(wt - m)
        attn = e * pl.reciprocal(jnp.sum(e, axis=-1, keepdims=True), approx=True)
        aggr = jnp.einsum("npk,nkc->npc", attn, sel.reshape(Gc * Bv, K, C),
                          preferred_element_type=jnp.float32)        # (G*Bv, P, C)
        aggr = aggr.reshape(Gc, Bv, P, C)

        # --- assemble [cls?, aggr, extra x rep]; duplicate extras never change max
        extra = extra_ref[...]                              # (G, Bv, 1, C)
        parts = []
        if has_cls:
            parts.append(jnp.broadcast_to(cls_ref[...][None], (Gc, Bv, 1, C)))
        parts.append(aggr)
        parts.append(jnp.broadcast_to(extra, (Gc, Bv, rep, C)))
        tok = jnp.concatenate(parts, axis=2)                # (G, Bv, T_pad, C)

        # --- L2-normalize tokens, lane-dense similarity vs the G*W caption words ---
        tok2 = tok.reshape(Gc * Bv * T_pad, C)
        ss = jnp.sum(tok2 * tok2, axis=-1, keepdims=True)
        tokn = tok2 * lax.rsqrt(jnp.maximum(ss, 1e-24))     # F.normalize(dim=-1)
        s = jnp.dot(tokn.astype(jnp.bfloat16), cap_ref[0],
                    preferred_element_type=jnp.float32)     # (G*Bv*T_pad, G*W)
        GW = s.shape[-1]
        smax = jnp.max(s.reshape(Gc, Bv, T_pad, GW), axis=2)          # (G, Bv, GW)

        # wsel zeroes cross-caption columns & padded words and carries 1/n_word.
        wsel = wsel_ref[0]                                  # (G, GW)
        sim = jnp.sum(smax * wsel[:, None, :], axis=-1)     # (G, Bv)
        out_ref[0] = sim

    return kernel


def fused_sim_pallas(prep, params):
    sel, extra = prep["sel"], prep["extra"]                 # (B_t,B_v,K,C), (B_t,B_v,1,C)
    cap_norm, lens, img_cls = prep["cap_norm"], prep["lens"], prep["img_cls"]
    has_cls = img_cls is not None
    B_t, B_v, K, C = sel.shape
    W = cap_norm.shape[1]
    Hp = params["w1p"].shape[1]
    P = params["w2s"].shape[1]
    n_cls = 1 if has_cls else 0
    T_pad = ((P + 1 + n_cls + 7) // 8) * 8

    # --- caption blocking: G captions per grid step so the similarity tile is
    # ~lane-dense (G*W >= 128 when B_t allows it) ------------------------------
    G = max(1, min(B_t, (128 + W - 1) // W))
    n_blk = (B_t + G - 1) // G
    B_t_pad = n_blk * G
    pad_t = B_t_pad - B_t
    GW = G * W

    sel_p = jnp.pad(sel, ((0, pad_t), (0, 0), (0, 0), (0, 0)))
    extra_p = jnp.pad(extra, ((0, pad_t), (0, 0), (0, 0), (0, 0)))
    cap_p = jnp.pad(cap_norm, ((0, pad_t), (0, 0), (0, 0)))
    # lane-dense bf16 caption slab: (n_blk, C, G*W)
    cap_slab = (cap_p.reshape(n_blk, G, W, C).transpose(0, 3, 1, 2)
                .reshape(n_blk, C, GW).astype(jnp.bfloat16))
    # per-block word weights: block-diagonal over captions, word-length mask, 1/n_word
    lens_p = jnp.pad(jnp.asarray(lens, jnp.int32), (0, pad_t))
    wmask = (jnp.arange(W)[None, :] < lens_p[:, None]).astype(jnp.float32)
    ww = (wmask / jnp.maximum(lens_p, 1)[:, None].astype(jnp.float32)).reshape(n_blk, G, W)
    eye = jnp.eye(G, dtype=jnp.float32)
    wsel = (eye[None, :, :, None] * ww[:, None, :, :]).reshape(n_blk, G, GW)

    Bv_t = _bv_tile(B_v)
    n_bv = B_v // Bv_t

    in_specs = [
        pl.BlockSpec((G, Bv_t, K, C), lambda g, b: (g, b, 0, 0)),   # sel
        pl.BlockSpec((G, Bv_t, 1, C), lambda g, b: (g, b, 0, 0)),   # extra token
        pl.BlockSpec((1, C, GW), lambda g, b: (g, 0, 0)),           # caption slab (bf16)
        pl.BlockSpec((1, G, GW), lambda g, b: (g, 0, 0)),           # word weights
    ]
    args = [sel_p, extra_p, cap_slab, wsel]
    if has_cls:
        in_specs.append(pl.BlockSpec((Bv_t, 1, C), lambda g, b: (b, 0, 0)))
        args.append(img_cls)
    in_specs += [
        pl.BlockSpec((C, Hp), lambda g, b: (0, 0)),
        pl.BlockSpec((1, Hp), lambda g, b: (0, 0)),
        pl.BlockSpec((Hp, P), lambda g, b: (0, 0)),
        pl.BlockSpec((1, P), lambda g, b: (0, 0)),
    ]
    args += [params["w1p"], params["b1p"], params["w2s"], params["b2s"]]

    out = pl.pallas_call(
        _make_fused_kernel(T_pad=T_pad, has_cls=has_cls),
        out_shape=jax.ShapeDtypeStruct((n_blk, G, B_v), jnp.float32),
        grid_spec=pltpu.PrefetchScalarGridSpec(
            num_scalar_prefetch=0,
            grid=(n_blk, n_bv),
            in_specs=in_specs,
            out_specs=pl.BlockSpec((1, G, Bv_t), lambda g, b: (g, 0, b)),
        ),
        compiler_params=pltpu.CompilerParams(
            dimension_semantics=("parallel", "parallel"),
            vmem_limit_bytes=_vmem_limit_bytes(),
        ),
    )(*args)
    return out.reshape(B_t_pad, B_v)[:B_t].T                # (B_v, B_t)


# ----------------------------------------------------------------------------
# Shared (XLA) pre-processing: normalizes, scores, argsort/top-k gather, mask,
# and the pre-reduced extra token (the (B_t,B_v,NK,C) `non` tensor is never built).
# ----------------------------------------------------------------------------
def prepare_inputs(img_embs, cap_embs, lens, sparse_ratio):
    B_v, L_v, C = img_embs.shape
    B_t, L_t, _ = cap_embs.shape
    img_norm = l2norm(img_embs)
    cap_norm = l2norm(cap_embs)
    has_cls = not is_sqr(L_v)
    if has_cls:
        img_cls = img_embs[:, 0:1, :]
        img_sp, img_sp_norm = img_embs[:, 1:, :], img_norm[:, 1:, :]
    else:
        img_cls = None
        img_sp, img_sp_norm = img_embs, img_norm
    L_sp = img_sp.shape[1]
    K = math.ceil(L_sp * sparse_ratio)

    # image self-attention (shared across captions)
    glo = l2norm(jnp.mean(img_sp, axis=1, keepdims=True))
    self_attn = jnp.sum(glo * img_sp_norm, axis=-1)                     # (B_v, L_sp)

    # caption global vectors with length masking, batched over captions
    wmask = (jnp.arange(L_t)[None, :] < lens[:, None]).astype(jnp.float32)
    denom = jnp.maximum(lens, 1).astype(jnp.float32)
    cap_mean = jnp.sum(cap_embs * wmask[..., None], axis=1) / denom[:, None]
    cap_glo = l2norm(cap_mean)                                          # (B_t, C)
    cap_attn = jnp.einsum("ic,blc->ibl", cap_glo, img_sp_norm)          # (B_t, B_v, L_sp)
    score = self_attn[None, :, :] + cap_attn

    # TokenSparse selection (data-dependent sort/gather/scatter stays in XLA)
    order = jnp.argsort(-score, axis=-1)
    keep_idx = order[..., :K]
    mask = jnp.zeros_like(score).at[
        jnp.arange(B_t)[:, None, None], jnp.arange(B_v)[None, :, None], keep_idx].set(1.0)
    # TODO(synk): avoid materializing the B_t-duplicated sel gather via in-kernel
    # DMA gather (scalar-prefetched keep_idx + img_sp in pl.ANY).
    img_b = jnp.broadcast_to(img_sp[None], (B_t, B_v, L_sp, C))
    sel = jnp.take_along_axis(img_b, keep_idx[..., None], axis=2)       # (B_t, B_v, K, C)

    # extra token pre-reduced: softmax over non-kept scores (permutation-invariant,
    # identical to PyTorch's sorted-softmax), weighted sum over img_sp.
    non_logits = jnp.where(mask > 0, -1e30, score)
    non_w = jax.nn.softmax(non_logits, axis=-1)                         # (B_t, B_v, L_sp)
    extra = jnp.einsum("ibl,blc->ibc", non_w, img_sp)[:, :, None, :]    # (B_t, B_v, 1, C)

    return dict(sel=sel, extra=extra, cap_norm=cap_norm, lens=lens, img_cls=img_cls,
                mask=mask, score=score, order=order, img_sp=img_sp)


# ----------------------------------------------------------------------------
# Pure-JAX reference (mirrors the PyTorch per-caption math; exact GELU/softmax)
# ----------------------------------------------------------------------------
def fused_sim_ref(prep, params, cap_lens):
    sel, cap_norm, img_cls = prep["sel"], prep["cap_norm"], prep["img_cls"]
    score, order, img_sp = prep["score"], prep["order"], prep["img_sp"]
    K = sel.shape[2]
    sims = []
    for i in range(sel.shape[0]):
        x = sel[i]                                                      # (B_v, K, C)
        mu = jnp.mean(x, axis=-1, keepdims=True)
        var = jnp.mean((x - mu) ** 2, axis=-1, keepdims=True)
        xn = (x - mu) / jnp.sqrt(var + 1e-5) * params["ln_g"][0] + params["ln_b"][0]
        h = jax.nn.gelu(xn @ params["w1"] + params["b1"][0], approximate=False)
        w = h @ params["w2"] + params["b2"][0]                          # (B_v, K, P)
        wt = jnp.swapaxes(w, 1, 2) * params["scale"][0, 0]              # (B_v, P, K)
        attn = jax.nn.softmax(wt, axis=-1)
        aggr = jnp.einsum("bpk,bkc->bpc", attn, x)
        # extra token exactly as PyTorch: sort -> softmax over non-kept -> weighted sum
        non_idx = order[i][:, K:]                                       # (B_v, NK)
        non_sc = jnp.take_along_axis(score[i], non_idx, axis=-1)
        nw = jax.nn.softmax(non_sc, axis=-1)[..., None]
        non_tok = jnp.take_along_axis(img_sp, non_idx[..., None], axis=1)
        extra = jnp.sum(non_tok * nw, axis=1, keepdims=True)
        parts = ([img_cls] if img_cls is not None else []) + [aggr, extra]
        tokens = l2norm(jnp.concatenate(parts, axis=1))
        n_word = int(cap_lens[i])
        cap_i = cap_norm[i, :n_word]                                    # (n_word, C)
        s = jnp.einsum("wc,btc->bwt", cap_i, tokens)
        # TODO(synk): mask_xattn_one_text is not defined in the provided source;
        # standard t2i similarity assumed (max over image tokens, mean over words).
        sims.append(jnp.mean(jnp.max(s, axis=2), axis=1, keepdims=True))
    return jnp.concatenate(sims, axis=1)                                # (B_v, B_t)


# ----------------------------------------------------------------------------
# Full forward (Pallas path is jittable; one compile per input-shape set)
# ----------------------------------------------------------------------------
def forward_pallas(params, img_embs, cap_embs, lens, sparse_ratio):
    prep = prepare_inputs(img_embs, cap_embs, lens, sparse_ratio)
    return fused_sim_pallas(prep, params), prep["mask"]


forward_pallas_jit = jax.jit(forward_pallas, static_argnames=("sparse_ratio",))


def forward_ref(params, img_embs, cap_embs, cap_lens, sparse_ratio):
    lens = jnp.asarray(cap_lens, jnp.int32)
    prep = prepare_inputs(img_embs, cap_embs, lens, sparse_ratio)
    return fused_sim_ref(prep, params, cap_lens), prep["mask"]


# ----------------------------------------------------------------------------
# Parameter init (TokenAggregation; CAA is unused in forward) + kernel-side prep
# ----------------------------------------------------------------------------
def init_params(key, dim, keeped_patches, dim_ratio=0.2):
    hidden = int(dim * dim_ratio)

    def lin_init(k, fan_in, fan_out):
        bound = 1.0 / math.sqrt(fan_in)
        kw, kb = jax.random.split(k)
        w = jax.random.uniform(kw, (fan_in, fan_out), jnp.float32, -bound, bound)
        b = jax.random.uniform(kb, (1, fan_out), jnp.float32, -bound, bound)
        return w, b

    k1, k2 = jax.random.split(key)
    w1, b1 = lin_init(k1, dim, hidden)
    w2, b2 = lin_init(k2, hidden, keeped_patches)
    return dict(ln_g=jnp.ones((1, dim), jnp.float32),
                ln_b=jnp.zeros((1, dim), jnp.float32),
                w1=w1, b1=b1, w2=w2, b2=b2,
                scale=jnp.ones((1, 1), jnp.float32))


def prepare_params(params):
    # Fold the LayerNorm affine into the first Linear, the learnable `scale` into the
    # second, and pad the hidden dim to a lane-aligned multiple of 128.
    C, H = params["w1"].shape
    P = params["w2"].shape[1]
    Hp = ((H + 127) // 128) * 128
    scale = params["scale"][0, 0]
    w1f = params["ln_g"][0][:, None] * params["w1"]                     # diag(g) @ w1
    b1f = params["ln_b"] @ params["w1"] + params["b1"]                  # b @ w1 + b1
    w1p = jnp.zeros((C, Hp), jnp.float32).at[:, :H].set(w1f)
    b1p = jnp.zeros((1, Hp), jnp.float32).at[:, :H].set(b1f)
    w2s = jnp.zeros((Hp, P), jnp.float32).at[:H, :].set(params["w2"] * scale)
    b2s = params["b2"] * scale
    return dict(params, w1p=w1p, b1p=b1p, w2s=w2s, b2s=b2s)


if __name__ == "__main__":
    def run_case(name, key, B_v, L_v, C, B_t, L_t, cap_lens, sparse_ratio, aggr_ratio):
        k1, k2, k3 = jax.random.split(key, 3)
        img_embs = jax.random.normal(k1, (B_v, L_v, C), jnp.float32)
        cap_embs = jax.random.normal(k2, (B_t, L_t, C), jnp.float32)
        L_sp = L_v - (0 if is_sqr(L_v) else 1)
        keeped = int(L_sp * aggr_ratio * sparse_ratio)
        params = prepare_params(init_params(k3, C, keeped, dim_ratio=0.2))

        lens = jnp.asarray(cap_lens, jnp.int32)
        sims, mask = forward_pallas_jit(params, img_embs, cap_embs, lens,
                                        sparse_ratio=sparse_ratio)
        sims = jax.block_until_ready(sims)
        mask = jax.block_until_ready(mask)

        sims_ref, mask_ref = forward_ref(params, img_embs, cap_embs, cap_lens, sparse_ratio)

        K = math.ceil(L_sp * sparse_ratio)
        assert sims.shape == (B_v, B_t), (name, sims.shape)
        assert mask.shape == (B_t, B_v, L_sp), (name, mask.shape)
        assert jnp.allclose(sims, sims_ref, rtol=2e-3, atol=2e-3), (name, sims, sims_ref)
        assert jnp.allclose(mask, mask_ref), name
        assert float(jnp.sum(mask)) == float(B_t * B_v * K), name

    key = jax.random.PRNGKey(0)
    ka, kb = jax.random.split(key)
    # opt.embed_size=128, num_patches=16, sparse_ratio=0.5, aggr_ratio=0.5 (no CLS token)
    run_case("no_cls", ka, B_v=2, L_v=16, C=128, B_t=3, L_t=8,
             cap_lens=[8, 6, 5], sparse_ratio=0.5, aggr_ratio=0.5)
    # same config but with a leading CLS token (L_v=17 is not a perfect square)
    run_case("cls", kb, B_v=2, L_v=17, C=128, B_t=3, L_t=8,
             cap_lens=[4, 8, 6], sparse_ratio=0.5, aggr_ratio=0.5)

    print("KERNEL_OK")
</pallas_src>

<mosaic_0001>
module attributes {stable_mosaic.version = 11 : i64} {
  func.func @kernel(%arg0: i32, %arg1: i32, %arg2: memref<3x2x8x128xf32, #tpu.memory_space<vmem>>, %arg3: memref<3x2x1x128xf32, #tpu.memory_space<vmem>>, %arg4: memref<1x128x24xbf16, #tpu.memory_space<vmem>>, %arg5: memref<1x3x24xf32, #tpu.memory_space<vmem>>, %arg6: memref<128x128xf32, #tpu.memory_space<vmem>>, %arg7: memref<1x128xf32, #tpu.memory_space<vmem>>, %arg8: memref<128x4xf32, #tpu.memory_space<vmem>>, %arg9: memref<1x4xf32, #tpu.memory_space<vmem>>, %arg10: memref<1x3x2xf32, #tpu.memory_space<vmem>>) attributes {dimension_semantics = [#tpu.dimension_semantics<parallel>, #tpu.dimension_semantics<parallel>], iteration_bounds = array<i64: 1, 1>, scalar_prefetch = 0 : i64, scratch_operands = 0 : i64, tpu.core_type = #tpu.core_type<tc>, window_params = [{transform_indices = @transform_0, window_bounds = array<i64: 3, 2, 8, 128>}, {transform_indices = @transform_1, window_bounds = array<i64: 3, 2, 1, 128>}, {transform_indices = @transform_2, window_bounds = array<i64: 1, 128, 24>}, {transform_indices = @transform_3, window_bounds = array<i64: 1, 3, 24>}, {pipeline_mode = #tpu.pipeline_mode<synchronous>, transform_indices = @transform_4, window_bounds = array<i64: 128, 128>}, {pipeline_mode = #tpu.pipeline_mode<synchronous>, transform_indices = @transform_5, window_bounds = array<i64: 1, 128>}, {pipeline_mode = #tpu.pipeline_mode<synchronous>, transform_indices = @transform_6, window_bounds = array<i64: 128, 4>}, {pipeline_mode = #tpu.pipeline_mode<synchronous>, transform_indices = @transform_7, window_bounds = array<i64: 1, 4>}, {transform_indices = @transform_8, window_bounds = array<i64: 1, 3, 2>}]} {
    %c0 = arith.constant 0 : index
    %c0_0 = arith.constant 0 : index
    %c0_1 = arith.constant 0 : index
    %c0_2 = arith.constant 0 : index
    %0 = vector.load %arg2[%c0, %c0_0, %c0_1, %c0_2] : memref<3x2x8x128xf32, #tpu.memory_space<vmem>>, vector<3x2x8x128xf32>
    %1 = vector.shape_cast %0 : vector<3x2x8x128xf32> to vector<48x128xf32>
    %cst = arith.constant dense<0.000000e+00> : vector<48xf32>
    %2 = vector.multi_reduction <add>, %1, %cst [1] : vector<48x128xf32> to vector<48xf32>
    %3 = vector.shape_cast %2 : vector<48xf32> to vector<48x1xf32>
    %cst_3 = arith.constant 1.280000e+02 : f32
    %4 = vector.broadcast %cst_3 : f32 to vector<48x1xf32>
    %5 = arith.divf %3, %4 : vector<48x1xf32>
    %6 = vector.broadcast %5 : vector<48x1xf32> to vector<48x128xf32>
    %7 = arith.subf %1, %6 : vector<48x128xf32>
    %8 = arith.mulf %7, %7 : vector<48x128xf32>
    %cst_4 = arith.constant dense<0.000000e+00> : vector<48xf32>
    %9 = vector.multi_reduction <add>, %8, %cst_4 [1] : vector<48x128xf32> to vector<48xf32>
    %10 = vector.shape_cast %9 : vector<48xf32> to vector<48x1xf32>
    %cst_5 = arith.constant 1.280000e+02 : f32
    %11 = vector.broadcast %cst_5 : f32 to vector<48x1xf32>
    %12 = arith.divf %10, %11 : vector<48x1xf32>
    %cst_6 = arith.constant 9.99999974E-6 : f32
    %13 = vector.broadcast %cst_6 : f32 to vector<48x1xf32>
    %14 = arith.addf %12, %13 : vector<48x1xf32>
    %15 = math.rsqrt %14 : vector<48x1xf32>
    %16 = vector.broadcast %15 : vector<48x1xf32> to vector<48x128xf32>
    %17 = arith.mulf %7, %16 : vector<48x128xf32>
    %c0_7 = arith.constant 0 : index
    %c0_8 = arith.constant 0 : index
    %18 = vector.load %arg6[%c0_7, %c0_8] : memref<128x128xf32, #tpu.memory_space<vmem>>, vector<128x128xf32>
    %cst_9 = arith.constant dense<0.000000e+00> : vector<48x128xf32>
    %19 = tpu.matmul %17, %18, %cst_9 {dimension_numbers = #tpu.dot_dimension_numbers<[1], [0], [0], [1], [0, 0, 1, 1], [], []>} : vector<48x128xf32>, vector<128x128xf32>, vector<48x128xf32> -> vector<48x128xf32>
    %c0_10 = arith.constant 0 : index
    %c0_11 = arith.constant 0 : index
    %20 = vector.load %arg7[%c0_10, %c0_11] : memref<1x128xf32, #tpu.memory_space<vmem>>, vector<1x128xf32>
    %21 = vector.broadcast %20 : vector<1x128xf32> to vector<48x128xf32>
    %22 = arith.addf %19, %21 : vector<48x128xf32>
    %cst_12 = arith.constant 5.000000e-01 : f32
    %23 = vector.broadcast %cst_12 : f32 to vector<48x128xf32>
    %24 = arith.mulf %23, %22 : vector<48x128xf32>
    %cst_13 = arith.constant 4.471500e-02 : f32
    %25 = vector.broadcast %cst_13 : f32 to vector<48x128xf32>
    %26 = arith.mulf %25, %22 : vector<48x128xf32>
    %27 = arith.mulf %26, %22 : vector<48x128xf32>
    %28 = arith.mulf %27, %22 : vector<48x128xf32>
    %29 = arith.addf %22, %28 : vector<48x128xf32>
    %cst_14 = arith.constant 0.797884583 : f32
    %30 = vector.broadcast %cst_14 : f32 to vector<48x128xf32>
    %31 = arith.mulf %30, %29 : vector<48x128xf32>
    %32 = math.tanh %31 : vector<48x128xf32>
    %cst_15 = arith.constant 1.000000e+00 : f32
    %33 = vector.broadcast %cst_15 : f32 to vector<48x128xf32>
    %34 = arith.addf %33, %32 : vector<48x128xf32>
    %35 = arith.mulf %24, %34 : vector<48x128xf32>
    %c0_16 = arith.constant 0 : index
    %c0_17 = arith.constant 0 : index
    %36 = vector.load %arg8[%c0_16, %c0_17] : memref<128x4xf32, #tpu.memory_space<vmem>>, vector<128x4xf32>
    %cst_18 = arith.constant dense<0.000000e+00> : vector<48x4xf32>
    %37 = tpu.matmul %35, %36, %cst_18 {dimension_numbers = #tpu.dot_dimension_numbers<[1], [0], [0], [1], [0, 0, 1, 1], [], []>} : vector<48x128xf32>, vector<128x4xf32>, vector<48x4xf32> -> vector<48x4xf32>
    %c0_19 = arith.constant 0 : index
    %c0_20 = arith.constant 0 : index
    %38 = vector.load %arg9[%c0_19, %c0_20] : memref<1x4xf32, #tpu.memory_space<vmem>>, vector<1x4xf32>
    %39 = vector.broadcast %38 : vector<1x4xf32> to vector<48x4xf32>
    %40 = arith.addf %37, %39 : vector<48x4xf32>
    %41 = vector.shape_cast %40 : vector<48x4xf32> to vector<6x8x4xf32>
    %42 = tpu.transpose %41, [0, 2, 1] : vector<6x8x4xf32> -> vector<6x4x8xf32>
    %cst_21 = arith.constant dense<0xFF800000> : vector<6x4xf32>
    %43 = vector.multi_reduction <maximumf>, %42, %cst_21 [2] : vector<6x4x8xf32> to vector<6x4xf32>
    %44 = vector.shape_cast %43 : vector<6x4xf32> to vector<6x4x1xf32>
    %45 = vector.broadcast %44 : vector<6x4x1xf32> to vector<6x4x8xf32>
    %46 = arith.subf %42, %45 : vector<6x4x8xf32>
    %47 = math.exp %46 : vector<6x4x8xf32>
    %cst_22 = arith.constant dense<0.000000e+00> : vector<6x4xf32>
    %48 = vector.multi_reduction <add>, %47, %cst_22 [2] : vector<6x4x8xf32> to vector<6x4xf32>
    %49 = vector.shape_cast %48 : vector<6x4xf32> to vector<6x4x1xf32>
    %50 = tpu.reciprocal %49 {approx = true} : vector<6x4x1xf32> -> vector<6x4x1xf32>
    %51 = vector.broadcast %50 : vector<6x4x1xf32> to vector<6x4x8xf32>
    %52 = arith.mulf %47, %51 : vector<6x4x8xf32>
    %53 = vector.shape_cast %0 : vector<3x2x8x128xf32> to vector<6x8x128xf32>
    "tpu.trace_start"() <{level = 10 : i32, message = "npk,nkc->npc"}> : () -> ()
    %cst_23 = arith.constant dense<0.000000e+00> : vector<6x4x128xf32>
    %54 = tpu.matmul %52, %53, %cst_23 {dimension_numbers = #tpu.dot_dimension_numbers<[2], [1], [1], [2], [0, 0, 0, 1, 1, 2], [0], [0]>} : vector<6x4x8xf32>, vector<6x8x128xf32>, vector<6x4x128xf32> -> vector<6x4x128xf32>
    "tpu.trace_stop"() : () -> ()
    %55 = vector.shape_cast %54 : vector<6x4x128xf32> to vector<3x2x4x128xf32>
    %c0_24 = arith.constant 0 : index
    %c0_25 = arith.constant 0 : index
    %c0_26 = arith.constant 0 : index
    %c0_27 = arith.constant 0 : index
    %56 = vector.load %arg3[%c0_24, %c0_25, %c0_26, %c0_27] : memref<3x2x1x128xf32, #tpu.memory_space<vmem>>, vector<3x2x1x128xf32>
    %57 = vector.shape_cast %56 : vector<3x2x1x128xf32> to vector<3x2x1x128xf32>
    %58 = vector.broadcast %57 : vector<3x2x1x128xf32> to vector<3x2x4x128xf32>
    %59 = tpu.concatenate %55, %58 in 2 : vector<3x2x4x128xf32>, vector<3x2x4x128xf32> -> vector<3x2x8x128xf32>
    %60 = vector.shape_cast %59 : vector<3x2x8x128xf32> to vector<48x128xf32>
    %61 = arith.mulf %60, %60 : vector<48x128xf32>
    %cst_28 = arith.constant dense<0.000000e+00> : vector<48xf32>
    %62 = vector.multi_reduction <add>, %61, %cst_28 [1] : vector<48x128xf32> to vector<48xf32>
    %63 = vector.shape_cast %62 : vector<48xf32> to vector<48x1xf32>
    %cst_29 = arith.constant 1.000000e-24 : f32
    %64 = vector.broadcast %cst_29 : f32 to vector<48x1xf32>
    %65 = arith.maximumf %63, %64 : vector<48x1xf32>
    %66 = math.rsqrt %65 : vector<48x1xf32>
    %67 = vector.broadcast %66 : vector<48x1xf32> to vector<48x128xf32>
    %68 = arith.mulf %60, %67 : vector<48x128xf32>
    %69 = arith.truncf %68 : vector<48x128xf32> to vector<48x128xbf16>
    %c0_30 = arith.constant 0 : index
    %c0_31 = arith.constant 0 : index
    %c0_32 = arith.constant 0 : index
    %70 = vector.load %arg4[%c0_30, %c0_31, %c0_32] : memref<1x128x24xbf16, #tpu.memory_space<vmem>>, vector<1x128x24xbf16>
    %71 = vector.shape_cast %70 : vector<1x128x24xbf16> to vector<128x24xbf16>
    %cst_33 = arith.constant dense<0.000000e+00> : vector<48x24xf32>
    %72 = tpu.matmul %69, %71, %cst_33 {dimension_numbers = #tpu.dot_dimension_numbers<[1], [0], [0], [1], [0, 0, 1, 1], [], []>} : vector<48x128xbf16>, vector<128x24xbf16>, vector<48x24xf32> -> vector<48x24xf32>
    %73 = vector.shape_cast %72 : vector<48x24xf32> to vector<3x2x8x24xf32>
    %cst_34 = arith.constant dense<0xFF800000> : vector<3x2x24xf32>
    %74 = vector.multi_reduction <maximumf>, %73, %cst_34 [2] : vector<3x2x8x24xf32> to vector<3x2x24xf32>
    %c0_35 = arith.constant 0 : index
    %c0_36 = arith.constant 0 : index
    %c0_37 = arith.constant 0 : index
    %75 = vector.load %arg5[%c0_35, %c0_36, %c0_37] : memref<1x3x24xf32, #tpu.memory_space<vmem>>, vector<1x3x24xf32>
    %76 = vector.shape_cast %75 : vector<1x3x24xf32> to vector<3x24xf32>
    %77 = vector.shape_cast %76 : vector<3x24xf32> to vector<3x1x24xf32>
    %78 = vector.broadcast %77 : vector<3x1x24xf32> to vector<3x2x24xf32>
    %79 = arith.mulf %74, %78 : vector<3x2x24xf32>
    %cst_38 = arith.constant dense<0.000000e+00> : vector<3x2xf32>
    %80 = vector.multi_reduction <add>, %79, %cst_38 [2] : vector<3x2x24xf32> to vector<3x2xf32>
    %c0_39 = arith.constant 0 : index
    %c0_40 = arith.constant 0 : index
    %c0_41 = arith.constant 0 : index
    %81 = vector.load %arg10[%c0_39, %c0_40, %c0_41] : memref<1x3x2xf32, #tpu.memory_space<vmem>>, vector<1x3x2xf32>
    %82 = vector.shape_cast %81 : vector<1x3x2xf32> to vector<3x2xf32>
    %83 = vector.shape_cast %80 : vector<3x2xf32> to vector<1x3x2xf32>
    tpu.vector_store %arg10[%c0_39, %c0_40, %c0_41], %83 {strides = array<i32>} : memref<1x3x2xf32, #tpu.memory_space<vmem>>, vector<1x3x2xf32>,
    return
  }
  func.func @transform_0(%arg0: i32, %arg1: i32) -> (i32, i32, i32, i32) {
    %c0_i32 = arith.constant 0 : i32
    %c0_i32_0 = arith.constant 0 : i32
    %c0_i32_1 = arith.constant 0 : i32
    return %arg0, %arg1, %c0_i32, %c0_i32_0 : i32, i32, i32, i32
  }
  func.func @transform_1(%arg0: i32, %arg1: i32) -> (i32, i32, i32, i32) {
    %c0_i32 = arith.constant 0 : i32
    %c0_i32_0 = arith.constant 0 : i32
    %c0_i32_1 = arith.constant 0 : i32
    return %arg0, %arg1, %c0_i32, %c0_i32_0 : i32, i32, i32, i32
  }
  func.func @transform_2(%arg0: i32, %arg1: i32) -> (i32, i32, i32) {
    %c0_i32 = arith.constant 0 : i32
    %c0_i32_0 = arith.constant 0 : i32
    %c0_i32_1 = arith.constant 0 : i32
    return %arg0, %c0_i32, %c0_i32_0 : i32, i32, i32
  }
  func.func @transform_3(%arg0: i32, %arg1: i32) -> (i32, i32, i32) {
    %c0_i32 = arith.constant 0 : i32
    %c0_i32_0 = arith.constant 0 : i32
    %c0_i32_1 = arith.constant 0 : i32
    return %arg0, %c0_i32, %c0_i32_0 : i32, i32, i32
  }
  func.func @transform_4(%arg0: i32, %arg1: i32) -> (i32, i32) {
    %c0_i32 = arith.constant 0 : i32
    %c0_i32_0 = arith.constant 0 : i32
    %c0_i32_1 = arith.constant 0 : i32
    return %c0_i32, %c0_i32_0 : i32, i32
  }
  func.func @transform_5(%arg0: i32, %arg1: i32) -> (i32, i32) {
    %c0_i32 = arith.constant 0 : i32
    %c0_i32_0 = arith.constant 0 : i32
    %c0_i32_1 = arith.constant 0 : i32
    return %c0_i32, %c0_i32_0 : i32, i32
  }
  func.func @transform_6(%arg0: i32, %arg1: i32) -> (i32, i32) {
    %c0_i32 = arith.constant 0 : i32
    %c0_i32_0 = arith.constant 0 : i32
    %c0_i32_1 = arith.constant 0 : i32
    return %c0_i32, %c0_i32_0 : i32, i32
  }
  func.func @transform_7(%arg0: i32, %arg1: i32) -> (i32, i32) {
    %c0_i32 = arith.constant 0 : i32
    %c0_i32_0 = arith.constant 0 : i32
    %c0_i32_1 = arith.constant 0 : i32
    return %c0_i32, %c0_i32_0 : i32, i32
  }
  func.func @transform_8(%arg0: i32, %arg1: i32) -> (i32, i32, i32) {
    %c0_i32 = arith.constant 0 : i32
    %c0_i32_0 = arith.constant 0 : i32
    return %arg0, %c0_i32, %arg1 : i32, i32, i32
  }
}

</mosaic_0001>

<bundles_post_ra>
// kernel: forward_pallas.1
= control target key start
LH: loop header
LB: loop body
LE: loop exit
PB: predicated region body
PF: predicated region fallthrough
CT: control target
= control target key end

     0   :  { %vm585_vm0 = vcmask 60416   ;;  %vm1808_vm1 = vmmov 0   ;;  %vm652_vm2 = vcmask 64512   ;;  %vm1133_vm3 = vcmask 1043456   ;;  %s2167_s0 = inlined_call_operand.vmem [shape: f32[3,2,8,128], index: 0, kind: input, shape index: {}]   ;;  %s2168_s4 = inlined_call_operand.vmem [shape: f32[128,128], index: 4, kind: input, shape index: {}]   ;;  %s2169_s6 = inlined_call_operand.vmem [shape: f32[128,4], index: 6, kind: input, shape index: {}]   ;;  %s2170_s5 = inlined_call_operand.vmem [shape: f32[1,128], index: 5, kind: input, shape index: {}]   ;;  %s2171_s7 = inlined_call_operand.vmem [shape: f32[1,4], index: 7, kind: input, shape index: {}]   ;;  %s2172_s2 = inlined_call_operand.vmem [shape: bf16[1,128,24], index: 2, kind: input, shape index: {}]   ;;  %s2173_s1 = inlined_call_operand.vmem [shape: f32[3,2,1,128], index: 1, kind: input, shape index: {}]   ;;  %s2174_s3 = inlined_call_operand.vmem [shape: f32[1,3,24], index: 3, kind: input, shape index: {}]   ;;  %s2175_s8 = inlined_call_operand.vmem [shape: f32[1,3,2], index: 8, kind: output, shape index: {}]  }
   0x1   :  { %v1858_v0 = vld [vmem:[%s2167_s0] sm:$0xff]  ;;  %v1863_v1 = vld [vmem:[%s2167_s0 + $0x10] sm:$0xff]  ;;  %v1870_v2 = vld [vmem:[%s2167_s0 + $0x8] sm:$0xff]  ;;  %vm1300_vm4 = vcmask 195584   ;;  %vm1396_vm5 = vcmask 1041409   ;;  %vm1405_vm6 = vcmask 189440  }
   0x2   :  { %36 = vadd.xlane.f32.xlu0 %v1858_v0  ;;  %40 = vadd.xlane.f32.xlu1 %v1863_v1  ;;  %v1875_v3 = vld [vmem:[%s2167_s0 + $0x18] sm:$0xff]  ;;  %v1882_v4 = vld [vmem:[%s2167_s0 + $0x20] sm:$0xff]  ;;  %v1887_v5 = vld [vmem:[%s2167_s0 + $0x28] sm:$0xff]  ;;  %vm1433_vm7 = vcmask 1042434   ;;  %vm1436_vm8 = vcmask 10240  }
   0x3   :  { %v103_v6 = vld [vmem:[%s2168_s4] sm:$0xff]  ;;  %v104_v7 = vld [vmem:[%s2168_s4 + $0x8] sm:$0xff]  ;;  %v105_v8 = vld [vmem:[%s2168_s4 + $0x10] sm:$0xff] }
   0x4   :  { %v1672_v9 = vpack.c.bf16 %v104_v7, %v103_v6  ;;  %v106_v10 = vld [vmem:[%s2168_s4 + $0x18] sm:$0xff]  ;;  %v107_v12 = vld [vmem:[%s2168_s4 + $0x20] sm:$0xff]  ;;  %v108_v13 = vld [vmem:[%s2168_s4 + $0x28] sm:$0xff] }
   0x5   :  { %v1676_v11 = vpack.c.bf16 %v106_v10, %v105_v8  ;;  %v1680_v14 = vpack.c.bf16 %v108_v13, %v107_v12  ;;  %v109_v39 = vld [vmem:[%s2168_s4 + $0x30] sm:$0xff]  ;;  %v110_v40 = vld [vmem:[%s2168_s4 + $0x38] sm:$0xff]  ;;  %v111_v42 = vld [vmem:[%s2168_s4 + $0x40] sm:$0xff] }
   0x6   :  { %38 = vadd.xlane.f32.xlu0 %v1870_v2  ;;  %42 = vadd.xlane.f32.xlu1 %v1875_v3  ;;  %v1684_v41 = vpack.c.bf16 %v110_v40, %v109_v39  ;;  %v112_v43 = vld [vmem:[%s2168_s4 + $0x48] sm:$0xff]  ;;  %v113_v45 = vld [vmem:[%s2168_s4 + $0x50] sm:$0xff]  ;;  %v114_v46 = vld [vmem:[%s2168_s4 + $0x58] sm:$0xff] }
   0x7   :  { %1673 = vmatprep.subr.bf16.mxu1 %v1672_v9  ;;  %v1688_v44 = vpack.c.bf16 %v112_v43, %v111_v42  ;;  %v1692_v47 = vpack.c.bf16 %v114_v46, %v113_v45  ;;  %v115_v48 = vld [vmem:[%s2168_s4 + $0x60] sm:$0xff]  ;;  %v116_v49 = vld [vmem:[%s2168_s4 + $0x68] sm:$0xff]  ;;  %v117_v51 = vld [vmem:[%s2168_s4 + $0x70] sm:$0xff] }
   0x8   :  { %1675 = vmatpush3.bf16.msra.mxu1 %v1672_v9  ;;  %v1696_v50 = vpack.c.bf16 %v116_v49, %v115_v48  ;;  %v118_v52 = vld [vmem:[%s2168_s4 + $0x78] sm:$0xff]  ;;  %v275_v54 = vld [vmem:[%s2169_s6] sm:$0xff]  ;;  %v276_v55 = vld [vmem:[%s2169_s6 + $0x8] sm:$0xff] }
   0x9   :  { %1677 = vmatprep.subr.bf16.mxu1 %v1676_v11  ;;  %v1700_v53 = vpack.c.bf16 %v118_v52, %v117_v51  ;;  %v1704_v56 = vpack.c.bf16 %v276_v55, %v275_v54  ;;  %v284_v39 = vld [vmem:[%s2169_s6 + $0x48] sm:$0xff]  ;;  %v286_v42 = vld [vmem:[%s2169_s6 + $0x58] sm:$0xff]  ;;  %v287_v43 = vld [vmem:[%s2169_s6 + $0x60] sm:$0xff] }
   0xa   :  { %44 = vadd.xlane.f32.xlu0 %v1882_v4  ;;  %46 = vadd.xlane.f32.xlu1 %v1887_v5  ;;  %v288_v45 = vld [vmem:[%s2169_s6 + $0x68] sm:$0xff]  ;;  %v290_v48 = vld [vmem:[%s2169_s6 + $0x78] sm:$0xff] }
   0xb   :  { %v1728_v46 = vpack.c.bf16 %v288_v45, %v287_v43 }
   0xc   :  { %1679 = vmatpush3.bf16.msra.mxu1 %v1676_v11 }
   0xd   :  { %1681 = vmatprep.subr.bf16.mxu1 %v1680_v14 }
  0x10   :  { %1683 = vmatpush3.bf16.msra.mxu1 %v1680_v14 }
  0x11   :  { %1685 = vmatprep.subr.bf16.mxu1 %v1684_v41 }
  0x14   :  { %1687 = vmatpush3.bf16.msra.mxu1 %v1684_v41  ;;  %v285_v41 = vld [vmem:[%s2169_s6 + $0x50] sm:$0xff] }
  0x15   :  { %1689 = vmatprep.subr.bf16.mxu1 %v1688_v44 }
  0x18   :  { %1691 = vmatpush3.bf16.msra.mxu1 %v1688_v44  ;;  %v1724_v44 = vpack.c.bf16 %v286_v42, %v285_v41 }
  0x19   :  { %1693 = vmatprep.subr.bf16.mxu1 %v1692_v47 }
  0x1c   :  { %1695 = vmatpush3.bf16.msra.mxu1 %v1692_v47  ;;  %v289_v47 = vld [vmem:[%s2169_s6 + $0x70] sm:$0xff] }
  0x1d   :  { %1697 = vmatprep.subr.bf16.mxu1 %v1696_v50  ;;  %v1732_v49 = vpack.c.bf16 %v290_v48, %v289_v47 }
  0x20   :  { %1699 = vmatpush3.bf16.msra.mxu1 %v1696_v50  ;;  %v1442_v50 = vld [vmem:[%s2170_s5] ss:$0 sm:$0xff] }
  0x21   :  { %1701 = vmatprep.subr.bf16.mxu1 %v1700_v53 }
  0x24   :  { %1703 = vmatpush3.bf16.msra.mxu1 %v1700_v53 }
  0x25   :  { %1705 = vmatprep.subr.bf16.mxu1 %v1704_v56 }
  0x8f   :  { %v37_v15 = vpop.xlane.xlu0 %36  ;;  %v41_v16 = vpop.xlane.xlu1 %40 }
  0x90   :  { %v49_v17 = vmul.f32 0.0078125, %v37_v15  ;;  %v51_v18 = vmul.f32 0.0078125, %v41_v16 }
  0x92   :  { %v1910_v19 = vsub.f32 %v1858_v0, %v49_v17  ;;  %v1913_v20 = vsub.f32 %v1863_v1, %v51_v18 }
  0x93   :  { %v39_v21 = vpop.xlane.xlu0 %38  ;;  %v43_v22 = vpop.xlane.xlu1 %42 }
  0x94   :  { %v50_v23 = vmul.f32 0.0078125, %v39_v21  ;;  %v61_v24 = vmul.f32 %v1910_v19, %v1910_v19  ;;  %v52_v25 = vmul.f32 0.0078125, %v43_v22  ;;  %v63_v28 = vmul.f32 %v1913_v20, %v1913_v20 }
  0x96   :  { %v1918_v26 = vsub.f32 %v1870_v2, %v50_v23  ;;  %67 = vadd.xlane.f32.xlu0 %v61_v24  ;;  %v1921_v27 = vsub.f32 %v1875_v3, %v52_v25 }
  0x97   :  { %v45_v29 = vpop.xlane.xlu0 %44  ;;  %v47_v30 = vpop.xlane.xlu1 %46 }
  0x98   :  { %v53_v31 = vmul.f32 0.0078125, %v45_v29  ;;  %v62_v32 = vmul.f32 %v1918_v26, %v1918_v26  ;;  %v54_v33 = vmul.f32 0.0078125, %v47_v30  ;;  %v64_v36 = vmul.f32 %v1921_v27, %v1921_v27 }
  0x9a   :  { %v1928_v34 = vsub.f32 %v1882_v4, %v53_v31  ;;  %71 = vadd.xlane.f32.xlu0 %v63_v28  ;;  %69 = vadd.xlane.f32.xlu1 %v62_v32  ;;  %v1931_v35 = vsub.f32 %v1887_v5, %v54_v33  ;;  %v280_v33 = vld [vmem:[%s2169_s6 + $0x28] sm:$0xff] }
  0x9c   :  { %v65_v37 = vmul.f32 %v1928_v34, %v1928_v34  ;;  %v66_v38 = vmul.f32 %v1931_v35, %v1931_v35 }
  0x9e   :  { %73 = vadd.xlane.f32.xlu1 %v64_v36  ;;  %75 = vadd.xlane.f32.xlu0 %v65_v37  ;;  %v282_v36 = vld [vmem:[%s2169_s6 + $0x38] sm:$0xff] }
  0xa2   :  { %77 = vadd.xlane.f32.xlu1 %v66_v38  ;;  %v283_v38 = vld [vmem:[%s2169_s6 + $0x40] sm:$0xff] }
  0xa3   :  { %v1720_v40 = vpack.c.bf16 %v284_v39, %v283_v38 }
 0x123   :  { %v68_v57 = vpop.xlane.xlu0 %67 }
 0x124   :  { %v79_v58 = vmul.f32 0.0078125, %v68_v57 }
 0x126   :  { %v85_v59 = vadd.f32 1e-05, %v79_v58 }
 0x127   :  { %v70_v60 = vpop.xlane.xlu1 %69  ;;  %v72_v61 = vpop.xlane.xlu0 %71 }
 0x128   :  { %1747 = vrsqrt.f32 %v85_v59  ;;  %v80_v62 = vmul.f32 0.0078125, %v70_v60  ;;  %v81_v63 = vmul.f32 0.0078125, %v72_v61 }
 0x12a   :  { %v86_v6 = vadd.f32 1e-05, %v80_v62  ;;  %v87_v7 = vadd.f32 1e-05, %v81_v63 }
 0x12b   :  { %v74_v8 = vpop.xlane.xlu1 %73  ;;  %v76_v9 = vpop.xlane.xlu0 %75 }
 0x12c   :  { %1749 = vrsqrt.f32 %v86_v6  ;;  %v82_v10 = vmul.f32 0.0078125, %v74_v8  ;;  %v83_v11 = vmul.f32 0.0078125, %v76_v9 }
 0x12d   :  { %1751 = vrsqrt.f32 %v87_v7 }
 0x12e   :  { %v88_v12 = vadd.f32 1e-05, %v82_v10  ;;  %v89_v13 = vadd.f32 1e-05, %v83_v11 }
 0x12f   :  { %v78_v14 = vpop.xlane.xlu1 %77 }
 0x130   :  { %1753 = vrsqrt.f32 %v88_v12  ;;  %v84_v15 = vmul.f32 0.0078125, %v78_v14 }
 0x131   :  { %1755 = vrsqrt.f32 %v89_v13 }
 0x132   :  { %v1748_v16 = vpop.eup %1747  ;;  %v90_v17 = vadd.f32 1e-05, %v84_v15 }
 0x133   :  { %v97_v18 = vmul.f32 %v1748_v16, %v1910_v19 }
 0x134   :  { %1757 = vrsqrt.f32 %v90_v17 }
 0x135   :  { %1564 = vmatprep.mubr.f32.mxu1 %v97_v18 }
 0x136   :  { %v1750_v21 = vpop.eup %1749 }
 0x137   :  { %v1752_v22 = vpop.eup %1751  ;;  %v98_v23 = vmul.f32 %v1750_v21, %v1918_v26  ;;  %v277_v26 = vld [vmem:[%s2169_s6 + $0x10] sm:$0xff] }
 0x138   :  { %v99_v24 = vmul.f32 %v1752_v22, %v1913_v20  ;;  %v278_v20 = vld [vmem:[%s2169_s6 + $0x18] sm:$0xff] }
 0x139   :  { %1565 = vmatmul.mubr.f32.vlgmr.msra.gmra.mrb[0].mxu1 %v98_v23  ;;  %v1708_v32 = vpack.c.bf16 %v278_v20, %v277_v26 }
 0x13a   :  { %v1754_v25 = vpop.eup %1753  ;;  %1567 = vmatprep.mubr.f32.mxu1 %v99_v24  ;;  %1707 = vmatpush3.bf16.msra.mxu1 %v1704_v56 }
 0x13b   :  { %v1756_v28 = vpop.eup %1755  ;;  %v100_v29 = vmul.f32 %v1754_v25, %v1921_v27  ;;  %1709 = vmatprep.subr.bf16.mxu1 %v1708_v32  ;;  %v279_v27 = vld [vmem:[%s2169_s6 + $0x20] sm:$0xff] }
 0x13c   :  { %v101_v30 = vmul.f32 %v1756_v28, %v1928_v34  ;;  %v1712_v34 = vpack.c.bf16 %v280_v33, %v279_v27 }
 0x13d   :  { %1568 = vmatmul.mubr.f32.gmra.mrb[2].mxu1 %v100_v29 }
 0x13e   :  { %v1758_v31 = vpop.eup %1757  ;;  %1570 = vmatprep.mubr.f32.mxu1 %v101_v30  ;;  %1711 = vmatpush3.bf16.msra.mxu1 %v1708_v32 }
 0x13f   :  { %v102_v19 = vmul.f32 %v1758_v31, %v1931_v35  ;;  %1713 = vmatprep.subr.bf16.mxu1 %v1712_v34  ;;  %v281_v35 = vld [vmem:[%s2169_s6 + $0x30] sm:$0xff] }
 0x140   :  { %v1716_v37 = vpack.c.bf16 %v282_v36, %v281_v35 }
 0x141   :  { %1571 = vmatmul.mubr.f32.gmra.mrb[4].mxu1 %v102_v19 }
 0x142   :  { %1715 = vmatpush3.bf16.msra.mxu1 %v1712_v34 }
 0x143   :  { %1717 = vmatprep.subr.bf16.mxu1 %v1716_v37 }
 0x146   :  { %1719 = vmatpush3.bf16.msra.mxu1 %v1716_v37 }
 0x147   :  { %1721 = vmatprep.subr.bf16.mxu1 %v1720_v40 }
 0x14a   :  { %1723 = vmatpush3.bf16.msra.mxu1 %v1720_v40 }
 0x14b   :  { %1725 = vmatprep.subr.bf16.mxu1 %v1724_v44 }
 0x14e   :  { %1727 = vmatpush3.bf16.msra.mxu1 %v1724_v44 }
 0x14f   :  { %1729 = vmatprep.subr.bf16.mxu1 %v1728_v46 }
 0x152   :  { %1731 = vmatpush3.bf16.msra.mxu1 %v1728_v46 }
 0x153   :  { %1733 = vmatprep.subr.bf16.mxu1 %v1732_v49 }
 0x156   :  { %1735 = vmatpush3.bf16.msra.mxu1 %v1732_v49 }
 0x20c   :  { %v1566_v51 = vpop.f32.mrb[0].mxu1 }
 0x20d   :  { %v198_v52 = vadd.f32 %v1566_v51, %v1442_v50  ;;  %v192_v53 = vpop.f32.mrb[1].mxu1 }
 0x20e   :  { %v193_v54 = vadd.f32 %v1442_v50, %v192_v53 }
 0x20f   :  { %v228_v55 = vmul.f32 0.044715, %v198_v52  ;;  %v222_v40 = vmul.f32 0.5, %v198_v52 }
 0x210   :  { %v227_v56 = vmul.f32 0.044715, %v193_v54  ;;  %v1569_v57 = vpop.f32.mrb[2].mxu1  ;;  %v221_v38 = vmul.f32 0.5, %v193_v54 }
 0x211   :  { %v234_v58 = vmul.f32 %v228_v55, %v198_v52  ;;  %v208_v59 = vadd.f32 %v1569_v57, %v1442_v50  ;;  %v202_v60 = vpop.f32.mrb[3].mxu1 }
 0x212   :  { %v233_v61 = vmul.f32 %v227_v56, %v193_v54  ;;  %v203_v62 = vadd.f32 %v1442_v50, %v202_v60  ;;  %v1443_v60 = vld [vmem:[%s2171_s7] ss:$0 sm:$0xff] }
 0x213   :  { %v240_v63 = vmul.f32 %v234_v58, %v198_v52  ;;  %v230_v6 = vmul.f32 0.044715, %v208_v59  ;;  %v224_v48 = vmul.f32 0.5, %v208_v59 }
 0x214   :  { %v229_v7 = vmul.f32 0.044715, %v203_v62  ;;  %v1572_v8 = vpop.f32.mrb[4].mxu1  ;;  %v239_v9 = vmul.f32 %v233_v61, %v193_v54  ;;  %v223_v46 = vmul.f32 0.5, %v203_v62 }
 0x215   :  { %v246_v10 = vadd.f32 %v240_v63, %v198_v52  ;;  %v236_v11 = vmul.f32 %v230_v6, %v208_v59  ;;  %v218_v12 = vadd.f32 %v1572_v8, %v1442_v50  ;;  %v212_v13 = vpop.f32.mrb[5].mxu1 }
 0x216   :  { %v235_v14 = vmul.f32 %v229_v7, %v203_v62  ;;  %v213_v15 = vadd.f32 %v1442_v50, %v212_v13  ;;  %v245_v16 = vadd.f32 %v239_v9, %v193_v54 }
 0x217   :  { %v252_v17 = vmul.f32 0.7978846, %v246_v10  ;;  %v232_v18 = vmul.f32 0.044715, %v218_v12  ;;  %v242_v21 = vmul.f32 %v236_v11, %v208_v59  ;;  %v226_v52 = vmul.f32 0.5, %v218_v12 }
 0x218   :  { %v231_v22 = vmul.f32 0.044715, %v213_v15  ;;  %v251_v23 = vmul.f32 0.7978846, %v245_v16  ;;  %v241_v24 = vmul.f32 %v235_v14, %v203_v62  ;;  %v225_v56 = vmul.f32 0.5, %v213_v15 }
 0x219   :  { %1759 = vtanh.f32 %v252_v17  ;;  %v238_v25 = vmul.f32 %v232_v18, %v218_v12  ;;  %v248_v28 = vadd.f32 %v242_v21, %v208_v59 }
 0x21a   :  { %v237_v29 = vmul.f32 %v231_v22, %v213_v15  ;;  %1761 = vtanh.f32 %v251_v23  ;;  %v247_v30 = vadd.f32 %v241_v24, %v203_v62 }
 0x21b   :  { %v254_v31 = vmul.f32 0.7978846, %v248_v28  ;;  %v244_v19 = vmul.f32 %v238_v25, %v218_v12 }
 0x21c   :  { %v253_v26 = vmul.f32 0.7978846, %v247_v30  ;;  %v243_v20 = vmul.f32 %v237_v29, %v213_v15 }
 0x21d   :  { %1763 = vtanh.f32 %v254_v31  ;;  %v250_v32 = vadd.f32 %v244_v19, %v218_v12 }
 0x21e   :  { %1765 = vtanh.f32 %v253_v26  ;;  %v249_v27 = vadd.f32 %v243_v20, %v213_v15 }
 0x21f   :  { %v256_v33 = vmul.f32 0.7978846, %v250_v32 }
 0x220   :  { %v255_v34 = vmul.f32 0.7978846, %v249_v27 }
 0x221   :  { %1767 = vtanh.f32 %v256_v33 }
 0x222   :  { %1769 = vtanh.f32 %v255_v34 }
 0x223   :  { %v1760_v35 = vpop.eup %1759 }
 0x224   :  { %v1762_v36 = vpop.eup %1761  ;;  %v264_v37 = vadd.f32 1.0, %v1760_v35 }
 0x225   :  { %v263_v39 = vadd.f32 1.0, %v1762_v36 }
 0x226   :  { %v270_v44 = vmul.f32 %v264_v37, %v222_v40 }
 0x227   :  { %v1764_v41 = vpop.eup %1763  ;;  %v269_v42 = vmul.f32 %v263_v39, %v221_v38 }
 0x228   :  { %v1766_v43 = vpop.eup %1765  ;;  %v266_v45 = vadd.f32 1.0, %v1764_v41 }
 0x229   :  { %1605 = vmatprep.mubr.f32.mxu1 %v269_v42  ;;  %v265_v47 = vadd.f32 1.0, %v1766_v43 }
 0x22a   :  { %1606 = vmatmul.mubr.f32.vlgmr.msra.gmra.mrb[6].mxu1 %v270_v44  ;;  %v272_v53 = vmul.f32 %v266_v45, %v224_v48 }
 0x22b   :  { %v1768_v49 = vpop.eup %1767  ;;  %v271_v50 = vmul.f32 %v265_v47, %v223_v46 }
 0x22c   :  { %v1770_v51 = vpop.eup %1769  ;;  %v268_v55 = vadd.f32 1.0, %v1768_v49 }
 0x22d   :  { %1608 = vmatprep.mubr.f32.mxu1 %v271_v50  ;;  %v267_v54 = vadd.f32 1.0, %v1770_v51 }
 0x22e   :  { %1609 = vmatmul.mubr.f32.gmra.mrb[8].mxu1 %v272_v53  ;;  %v274_v58 = vmul.f32 %v268_v55, %v226_v52  ;;  %v1807_v52 = vmov 0.0  }
 0x22f   :  { %v273_v57 = vmul.f32 %v267_v54, %v225_v56  ;;  %1614 = vmatprep.subr.mxu0 %v1807_v52  ;;  %1616 = vmatprep.mubr.msk.f32.mxu0 %vm1808_vm1, %v1807_v52 }
 0x230   :  { %1615 = vmatpush3.msra.mxu0 %v1858_v0 }
 0x231   :  { %1611 = vmatprep.mubr.f32.mxu1 %v273_v57  ;;  %1619 = vmatprep.subr.mxu0 %v1807_v52 }
 0x232   :  { %1612 = vmatmul.mubr.f32.gmra.mrb[10].mxu1 %v274_v58 }
 0x2fd   :  { %v1607_v61 = vpop.f32.mrb[6].mxu1 }
 0x2fe   :  { %v370_v59 = vadd.f32 %v1607_v61, %v1443_v60  ;;  %v364_v62 = vpop.f32.mrb[7].mxu1 }
 0x2ff   :  { %v365_v63 = vadd.f32 %v1443_v60, %v364_v62 }
 0x300   :  { %425 = vxpose.xlu1.b32.start.end [1/1] (short) (narrow) %v370_v59, 8 }
 0x301   :  { %v1610_v6 = vpop.f32.mrb[8].mxu1  ;;  %393 = vxpose.xlu0.b32.start.end [1/1] (short) (narrow) %v365_v63, 8 }
 0x302   :  { %v380_v7 = vadd.f32 %v1610_v6, %v1443_v60  ;;  %v374_v8 = vpop.f32.mrb[9].mxu1 }
 0x303   :  { %v375_v11 = vadd.f32 %v1443_v60, %v374_v8 }
 0x305   :  { %489 = vxpose.xlu0.b32.start.end [1/1] (short) (narrow) %v380_v7, 8  ;;  %v1613_v9 = vpop.f32.mrb[10].mxu1 }
 0x306   :  { %v384_v10 = vpop.f32.mrb[11].mxu1  ;;  %v390_v13 = vadd.f32 %v1613_v9, %v1443_v60 }
 0x307   :  { %v385_v12 = vadd.f32 %v1443_v60, %v384_v10 }
 0x309   :  { %457 = vxpose.xlu0.b32.start.end [1/1] (short) (narrow) %v375_v11, 8  ;;  %521 = vxpose.xlu1.b32.start.end [1/1] (short) (narrow) %v385_v12, 8 }
 0x30d   :  { %553 = vxpose.xlu0.b32.start.end [1/1] (short) (narrow) %v390_v13, 8  ;;  %v1741_v13 = vld [vmem:[%s2172_s2 + $0x10] sm:$0xff]  }
 0x380   :  { %v441_v14 = vpop.trf.xlu1 }
 0x381   :  { %v409_v15 = vpop.trf.xlu0  ;;  %v589_v16 = vsel %vm585_vm0, %v441_v14, -inf }
 0x382   :  { %590 = vmax.xlane.f32.xlu0 %v589_v16  ;;  %v586_v17 = vsel %vm585_vm0, %v409_v15, -inf }
 0x383   :  { %587 = vmax.xlane.f32.xlu1 %v586_v17 }
 0x385   :  { %v505_v18 = vpop.trf.xlu0 }
 0x386   :  { %v595_v28 = vsel %vm585_vm0, %v505_v18, -inf }
 0x389   :  { %v473_v21 = vpop.trf.xlu0  ;;  %v537_v22 = vpop.trf.xlu1 }
 0x38a   :  { %v592_v23 = vsel %vm585_vm0, %v473_v21, -inf  ;;  %v598_v24 = vsel %vm585_vm0, %v537_v22, -inf }
 0x38b   :  { %593 = vmax.xlane.f32.xlu1 %v592_v23  ;;  %599 = vmax.xlane.f32.xlu0 %v598_v24 }
 0x38d   :  { %v569_v25 = vpop.trf.xlu0 }
 0x38e   :  { %v601_v29 = vsel %vm585_vm0, %v569_v25, -inf }
 0x38f   :  { %596 = vmax.xlane.f32.xlu1 %v595_v28  ;;  %v1452_v28 = vld [vmem:[%s2173_s1 + $0x2] ss:$0 sm:$0xff] }
 0x393   :  { %602 = vmax.xlane.f32.xlu1 %v601_v29 }
 0x40f   :  { %v591_v30 = vpop.xlane.xlu0 %590 }
 0x410   :  { %v605_v31 = vsub.f32 %v441_v14, %v591_v30  ;;  %v588_v19 = vpop.xlane.xlu1 %587  ;;  %v1450_v14 = vld [vmem:[%s2173_s1] ss:$0 sm:$0xff] }
 0x411   :  { %v604_v26 = vsub.f32 %v409_v15, %v588_v19 }
 0x412   :  { %v612_v20 = vmul.f32 1.442695, %v605_v31 }
 0x413   :  { %v610_v32 = vmul.f32 1.442695, %v604_v26  ;;  %v1453_v26 = vld [vmem:[%s2173_s1 + $0x3] ss:$0 sm:$0xff] }
 0x414   :  { %1771 = vpow2.f32 %v612_v20 }
 0x415   :  { %1773 = vpow2.f32 %v610_v32 }
 0x418   :  { %v600_v27 = vpop.xlane.xlu0 %599  ;;  %v594_v33 = vpop.xlane.xlu1 %593 }
 0x419   :  { %v608_v34 = vsub.f32 %v537_v22, %v600_v27  ;;  %v606_v35 = vsub.f32 %v473_v21, %v594_v33  ;;  %v1451_v21 = vld [vmem:[%s2173_s1 + $0x1] ss:$0 sm:$0xff] }
 0x41b   :  { %v614_v36 = vmul.f32 1.442695, %v606_v35  ;;  %v618_v37 = vmul.f32 1.442695, %v608_v34  ;;  %v1454_v34 = vld [vmem:[%s2173_s1 + $0x4] ss:$0 sm:$0xff] }
 0x41c   :  { %v597_v38 = vpop.xlane.xlu1 %596 }
 0x41d   :  { %v607_v39 = vsub.f32 %v505_v18, %v597_v38  ;;  %1775 = vpow2.f32 %v614_v36 }
 0x41e   :  { %v1772_v40 = vpop.eup %1771  ;;  %1777 = vpow2.f32 %v618_v37 }
 0x41f   :  { %v1774_v41 = vpop.eup %1773  ;;  %v616_v42 = vmul.f32 1.442695, %v607_v39  ;;  %v625_v43 = vsel %vm585_vm0, %v1772_v40, 0.0  ;;  %v1455_v39 = vld [vmem:[%s2173_s1 + $0x5] ss:$0 sm:$0xff] }
 0x420   :  { %626 = vadd.xlane.f32.xlu1 %v625_v43  ;;  %v603_v44 = vpop.xlane.xlu1 %602  ;;  %v622_v45 = vsel %vm585_vm0, %v1774_v41, 0.0 }
 0x421   :  { %1779 = vpow2.f32 %v616_v42  ;;  %v609_v46 = vsub.f32 %v569_v25, %v603_v44  ;;  %623 = vadd.xlane.f32.xlu0 %v622_v45  ;;  %v1743_v45 = vld [vmem:[%s2172_s2 + $0x20] sm:$0xff]  }
 0x423   :  { %v620_v47 = vmul.f32 1.442695, %v609_v46  ;;  %v1744_v46 = vld [vmem:[%s2172_s2 + $0x28] sm:$0xff]  }
 0x425   :  { %1781 = vpow2.f32 %v620_v47  ;;  %v1745_v47 = vld [vmem:[%s2172_s2 + $0x30] sm:$0xff]  }
 0x427   :  { %v1776_v48 = vpop.eup %1775 }
 0x428   :  { %v628_v49 = vsel %vm585_vm0, %v1776_v48, 0.0  ;;  %v1778_v50 = vpop.eup %1777 }
 0x429   :  { %629 = vadd.xlane.f32.xlu0 %v628_v49  ;;  %v634_v55 = vsel %vm585_vm0, %v1778_v50, 0.0 }
 0x42b   :  { %v1780_v51 = vpop.eup %1779 }
 0x42c   :  { %v631_v53 = vsel %vm585_vm0, %v1780_v51, 0.0 }
 0x42d   :  { %632 = vadd.xlane.f32.xlu1 %v631_v53  ;;  %635 = vadd.xlane.f32.xlu0 %v634_v55 }
 0x42f   :  { %v1782_v56 = vpop.eup %1781 }
 0x430   :  { %v637_v54 = vsel %vm585_vm0, %v1782_v56, 0.0 }
 0x431   :  { %638 = vadd.xlane.f32.xlu1 %v637_v54 }
 0x4ad   :  { %v627_v57 = vpop.xlane.xlu1 %626 }
 0x4ae   :  { %v624_v58 = vpop.xlane.xlu0 %623 }
 0x4af   :  { %1783 = vrcp.f32 %v624_v58 }
 0x4b0   :  { %1785 = vrcp.f32 %v627_v57 }
 0x4b6   :  { %v630_v60 = vpop.xlane.xlu0 %629 }
 0x4b7   :  { %1787 = vrcp.f32 %v630_v60 }
 0x4b9   :  { %v1784_v61 = vpop.eup %1783 }
 0x4ba   :  { %v633_v59 = vpop.xlane.xlu1 %632  ;;  %v646_v62 = vmul.f32 %v1784_v61, %v1774_v41  ;;  %v1786_v63 = vpop.eup %1785 }
 0x4bb   :  { %v636_v6 = vpop.xlane.xlu0 %635  ;;  %1789 = vrcp.f32 %v633_v59  ;;  %v647_v0 = vmul.f32 %v1786_v63, %v1772_v40  ;;  %v1742_v40 = vld [vmem:[%s2172_s2 + $0x18] sm:$0xff]  }
 0x4bc   :  { %1617 = vmatmul.mubr.msk.f32.vlgmr.msra.gmra.mrb[0].mxu0 %vm652_vm2, %v646_v62  ;;  %1791 = vrcp.f32 %v636_v6 }
 0x4bd   :  { %1620 = vmatpush3.msra.mxu0 %v1870_v2  ;;  %1621 = vmatprep.mubr.msk.f32.mxu0 %vm1808_vm1, %v1807_v52 }
 0x4be   :  { %1624 = vmatprep.subr.mxu0 %v1807_v52  ;;  %v639_v7 = vpop.xlane.xlu1 %638 }
 0x4bf   :  { %1793 = vrcp.f32 %v639_v7 }
 0x4c0   :  { %1622 = vmatmul.mubr.msk.f32.vlgmr.msra.gmra.mrb[2].mxu0 %vm652_vm2, %v647_v0 }
 0x4c1   :  { %1625 = vmatpush3.msra.mxu0 %v1863_v1  ;;  %1626 = vmatprep.mubr.msk.f32.mxu0 %vm1808_vm1, %v1807_v52  ;;  %v1788_v8 = vpop.eup %1787 }
 0x4c2   :  { %1629 = vmatprep.subr.mxu0 %v1807_v52  ;;  %v648_v2 = vmul.f32 %v1788_v8, %v1776_v48  ;;  %v1746_v48 = vld [vmem:[%s2172_s2 + $0x38] sm:$0xff]  }
 0x4c4   :  { %1627 = vmatmul.mubr.msk.f32.vlgmr.msra.gmra.mrb[4].mxu0 %vm652_vm2, %v648_v2 }
 0x4c5   :  { %v1790_v9 = vpop.eup %1789  ;;  %1630 = vmatpush3.msra.mxu0 %v1875_v3  ;;  %1631 = vmatprep.mubr.msk.f32.mxu0 %vm1808_vm1, %v1807_v52 }
 0x4c6   :  { %v649_v10 = vmul.f32 %v1790_v9, %v1780_v51  ;;  %1634 = vmatprep.subr.mxu0 %v1807_v52  ;;  %v1792_v1 = vpop.eup %1791 }
 0x4c7   :  { %v650_v11 = vmul.f32 %v1792_v1, %v1778_v50 }
 0x4c8   :  { %1632 = vmatmul.mubr.msk.f32.vlgmr.msra.gmra.mrb[6].mxu0 %vm652_vm2, %v649_v10 }
 0x4c9   :  { %1635 = vmatpush3.msra.mxu0 %v1882_v4  ;;  %1636 = vmatprep.mubr.msk.f32.mxu0 %vm1808_vm1, %v1807_v52  ;;  %v1794_v12 = vpop.eup %1793  ;;  %v1739_v4 = vld [vmem:[%s2172_s2] sm:$0xff]  }
 0x4ca   :  { %1639 = vmatprep.subr.mxu0 %v1807_v52  ;;  %v651_v3 = vmul.f32 %v1794_v12, %v1782_v56 }
 0x4cc   :  { %1637 = vmatmul.mubr.msk.f32.vlgmr.msra.gmra.mrb[8].mxu0 %vm652_vm2, %v650_v11 }
 0x4cd   :  { %1640 = vmatpush3.msra.mxu0 %v1887_v5  ;;  %1641 = vmatprep.mubr.msk.f32.mxu0 %vm1808_vm1, %v1807_v52  ;;  %v1740_v5 = vld [vmem:[%s2172_s2 + $0x8] sm:$0xff]  }
 0x4ce   :  { %1644 = vmatprep.subr.bf16.mxu0 %v1807_v52 }
 0x4d0   :  { %1642 = vmatmul.mubr.msk.f32.vlgmr.msra.gmra.mrb[10].mxu0 %vm652_vm2, %v651_v3 }
 0x4d1   :  { %1660 = vmatprep.mubr.msk.bf16.mxu0 %vm1808_vm1, %v1807_v52  ;;  %1645 = vmatpush3.bf16.msra.mxu0 %v1739_v4 }
 0x4d2   :  { %1646 = vmatprep.subr.bf16.mxu0 %v1807_v52 }
 0x4d5   :  { %1647 = vmatpush3.bf16.msra.mxu0 %v1740_v5 }
 0x4d6   :  { %1648 = vmatprep.subr.bf16.mxu0 %v1807_v52 }
 0x4d9   :  { %1649 = vmatpush3.bf16.msra.mxu0 %v1741_v13  ;;  %v1356_v13 = vlaneseq }
 0x4da   :  { %1650 = vmatprep.subr.bf16.mxu0 %v1807_v52 }
 0x4dd   :  { %1651 = vmatpush3.bf16.msra.mxu0 %v1742_v40 }
 0x4de   :  { %1652 = vmatprep.subr.bf16.mxu0 %v1807_v52 }
 0x4e1   :  { %1653 = vmatpush3.bf16.msra.mxu0 %v1743_v45 }
 0x4e2   :  { %1654 = vmatprep.subr.bf16.mxu0 %v1807_v52 }
 0x4e5   :  { %1655 = vmatpush3.bf16.msra.mxu0 %v1744_v46 }
 0x4e6   :  { %1656 = vmatprep.subr.bf16.mxu0 %v1807_v52 }
 0x4e9   :  { %1657 = vmatpush3.bf16.msra.mxu0 %v1745_v47 }
 0x4ea   :  { %1658 = vmatprep.subr.bf16.mxu0 %v1807_v52 }
 0x4ed   :  { %1659 = vmatpush3.bf16.msra.mxu0 %v1746_v48 }
 0x58f   :  { %v722_v15 = vpop.f32.mrb[0].mxu0 }
 0x590   :  { %v2090_v16 = vsel %vm1133_vm3, %v722_v15, %v1450_v14  ;;  %v1618_v17 = vpop.f32.mrb[1].mxu0  ;;  %v1357_v14 = vshrl.u32 %v1356_v13, 7  ;;  %v1419_v15 = vand.u32 127, %v1356_v13 }
 0x591   :  { %v1140_v18 = vmul.f32 %v2090_v16, %v2090_v16  ;;  %v1809_v17 = vmov 1966171168  }
 0x592   :  { %v1370_v40 = vsub.s32 0, %v1357_v14 }
 0x593   :  { %1146 = vadd.xlane.f32.xlu0 %v1140_v18  ;;  %v795_v22 = vpop.f32.mrb[2].mxu0  ;;  %v1354_v18 = vunpack.c.l.s4 %v1809_v17 }
 0x594   :  { %v1135_v23 = vsel %vm1133_vm3, %v795_v22, %v1451_v21  ;;  %v1623_v24 = vpop.f32.mrb[3].mxu0 }
 0x595   :  { %v1141_v25 = vmul.f32 %v1135_v23, %v1135_v23  ;;  %v1355_v24 = vunpack.c.0.s8 %v1354_v18 }
 0x597   :  { %1148 = vadd.xlane.f32.xlu1 %v1141_v25  ;;  %v868_v29 = vpop.f32.mrb[4].mxu0 }
 0x598   :  { %v2102_v30 = vsel %vm1133_vm3, %v868_v29, %v1452_v28  ;;  %v1628_v31 = vpop.f32.mrb[5].mxu0 }
 0x599   :  { %v1142_v19 = vmul.f32 %v2102_v30, %v2102_v30 }
 0x59b   :  { %1150 = vadd.xlane.f32.xlu0 %v1142_v19  ;;  %v941_v20 = vpop.f32.mrb[6].mxu0  ;;  %v1358_v19 = vsub.s32 %v1355_v24, %v1357_v14 }
 0x59c   :  { %v1137_v32 = vsel %vm1133_vm3, %v941_v20, %v1453_v26  ;;  %v1633_v27 = vpop.f32.mrb[7].mxu0 }
 0x59d   :  { %v1143_v33 = vmul.f32 %v1137_v32, %v1137_v32 }
 0x59f   :  { %1152 = vadd.xlane.f32.xlu1 %v1143_v33  ;;  %v1014_v35 = vpop.f32.mrb[8].mxu0 }
 0x5a0   :  { %v1138_v36 = vsel %vm1133_vm3, %v1014_v35, %v1454_v34  ;;  %v1638_v37 = vpop.f32.mrb[9].mxu0 }
 0x5a1   :  { %v1144_v38 = vmul.f32 %v1138_v36, %v1138_v36 }
 0x5a3   :  { %1154 = vadd.xlane.f32.xlu0 %v1144_v38  ;;  %v1087_v41 = vpop.f32.mrb[10].mxu0 }
 0x5a4   :  { %v1139_v42 = vsel %vm1133_vm3, %v1087_v41, %v1455_v39  ;;  %v1643_v43 = vpop.f32.mrb[11].mxu0 }
 0x5a5   :  { %v1145_v44 = vmul.f32 %v1139_v42, %v1139_v42 }
 0x5a7   :  { %1156 = vadd.xlane.f32.xlu1 %v1145_v44 }
 0x620   :  { %v1147_v49 = vpop.xlane.xlu0 %1146 }
 0x621   :  { %v1158_v50 = vmax.f32 %v1147_v49, 1e-24 }
 0x623   :  { %1795 = vrsqrt.f32 %v1158_v50 }
 0x624   :  { %v1149_v51 = vpop.xlane.xlu1 %1148 }
 0x625   :  { %v1159_v53 = vmax.f32 %v1149_v51, 1e-24 }
 0x627   :  { %1797 = vrsqrt.f32 %v1159_v53 }
 0x628   :  { %v1151_v55 = vpop.xlane.xlu0 %1150 }
 0x629   :  { %v1160_v56 = vmax.f32 %v1151_v55, 1e-24 }
 0x62b   :  { %1799 = vrsqrt.f32 %v1160_v56 }
 0x62c   :  { %v1153_v54 = vpop.xlane.xlu1 %1152 }
 0x62d   :  { %v1161_v57 = vmax.f32 %v1153_v54, 1e-24  ;;  %v1796_v58 = vpop.eup %1795 }
 0x62e   :  { %v1170_v62 = vmul.f32 %v1796_v58, %v2090_v16  ;;  %v2143_v16 = vsub.s32 %v1419_v15, %v1357_v14 }
 0x62f   :  { %1801 = vrsqrt.f32 %v1161_v57 }
 0x630   :  { %v1155_v61 = vpop.xlane.xlu0 %1154 }
 0x631   :  { %v1798_v60 = vpop.eup %1797  ;;  %v1162_v59 = vmax.f32 %v1155_v61, 1e-24 }
 0x632   :  { %v1171_v63 = vmul.f32 %v1798_v60, %v1135_v23 }
 0x633   :  { %1803 = vrsqrt.f32 %v1162_v59 }
 0x634   :  { %v1176_v6 = vpack.c.bf16 %v1171_v63, %v1170_v62  ;;  %v1157_v0 = vpop.xlane.xlu1 %1156 }
 0x635   :  { %v1163_v7 = vmax.f32 %v1157_v0, 1e-24  ;;  %v1800_v8 = vpop.eup %1799 }
 0x636   :  { %1661 = vmatmul.mubr.bf16.vlgmr.msra.gmra.mrb[12].mxu0 %v1176_v6  ;;  %v1172_v9 = vmul.f32 %v1800_v8, %v2102_v30 }
 0x637   :  { %1664 = vmatprep.mubr.msk.bf16.mxu0 %vm1808_vm1, %v1807_v52  ;;  %1805 = vrsqrt.f32 %v1163_v7 }
 0x639   :  { %v1802_v2 = vpop.eup %1801 }
 0x63a   :  { %v1173_v10 = vmul.f32 %v1802_v2, %v1137_v32  ;;  %v1464_v32 = vld.sshfl [vmem:[%s2174_s3] sm:$0x13 pattern:$0x75316420] }
 0x63b   :  { %v1359_v35 = vrot.slane %v1464_v32, %v1358_v19  ;;  %v1352_v51 = vcombine.high %v1464_v32, %v1464_v32 }
 0x63c   :  { %v1177_v1 = vpack.c.bf16 %v1173_v10, %v1172_v9 }
 0x63d   :  { %v1804_v11 = vpop.eup %1803  ;;  %v1371_v50 = vrot.slane %v1359_v35, %v1370_v40  ;;  %v1366_v63 = vrot.slane %v1352_v51, %v1358_v19 }
 0x63e   :  { %1665 = vmatmul.mubr.bf16.gmra.mrb[16].mxu0 %v1177_v1  ;;  %v1174_v3 = vmul.f32 %v1804_v11, %v1138_v36 }
 0x63f   :  { %1668 = vmatprep.mubr.msk.bf16.mxu0 %vm1808_vm1, %v1807_v52 }
 0x641   :  { %v1806_v12 = vpop.eup %1805 }
 0x642   :  { %v1175_v4 = vmul.f32 %v1806_v12, %v1139_v42 }
 0x644   :  { %v1178_v5 = vpack.c.bf16 %v1175_v4, %v1174_v3  ;;  %v1375_v4 = vrot.slane %v1366_v63, %v1370_v40 }
 0x646   :  { %1669 = vmatmul.mubr.bf16.gmra.mrb[20].mxu0 %v1178_v5 }
 0x709   :  { %v1277_v21 = vpop.f32.mrb[12].mxu0 }
 0x70a   :  { %v1301_v22 = vsel %vm1300_vm4, %v1277_v21, -inf  ;;  %v1662_v23 = vpop.f32.mrb[13].mxu0 }
 0x70b   :  { %v1302_v25 = vrot.slane %v1301_v22, 4  ;;  %v1280_v52 = vpop.f32.mrb[14].mxu0 }
 0x70c   :  { %v1308_v28 = vsel %vm1300_vm4, %v1280_v52, -inf  ;;  %v1663_v29 = vpop.f32.mrb[15].mxu0 }
 0x70d   :  { %v1303_v30 = vmax.f32 %v1301_v22, %v1302_v25  ;;  %v1309_v31 = vrot.slane %v1308_v28, 4  ;;  %v1367_v22 = vcombine.high %v1359_v35, %v1359_v35 }
 0x70f   :  { %v1304_v26 = vrot.slane %v1303_v30, 2  ;;  %v1310_v20 = vmax.f32 %v1308_v28, %v1309_v31 }
 0x711   :  { %v1305_v27 = vmax.f32 %v1303_v30, %v1304_v26  ;;  %v1311_v33 = vrot.slane %v1310_v20, 2  ;;  %v1285_v34 = vpop.f32.mrb[16].mxu0  ;;  %v1379_v26 = vrot.slane %v1367_v22, %v1370_v40 }
 0x712   :  { %v1315_v38 = vsel %vm1300_vm4, %v1285_v34, -inf  ;;  %v1666_v39 = vpop.f32.mrb[17].mxu0 }
 0x713   :  { %v1306_v36 = vrot.slane %v1305_v27, 1  ;;  %v1312_v37 = vmax.f32 %v1310_v20, %v1311_v33  ;;  %v1316_v41 = vrot.slane %v1315_v38, 4  ;;  %v1288_v42 = vpop.f32.mrb[18].mxu0 }
 0x714   :  { %v1322_v44 = vsel %vm1300_vm4, %v1288_v42, -inf  ;;  %v1667_v45 = vpop.f32.mrb[19].mxu0 }
 0x715   :  { %v1313_v43 = vrot.slane %v1312_v37, 1  ;;  %v1317_v46 = vmax.f32 %v1315_v38, %v1316_v41  ;;  %v1323_v47 = vrot.slane %v1322_v44, 4  ;;  %v1307_v48 = vmax.f32 %v1305_v27, %v1306_v36 }
 0x717   :  { %v1314_v49 = vmax.f32 %v1312_v37, %v1313_v43  ;;  %v1318_v53 = vrot.slane %v1317_v46, 2  ;;  %v1324_v55 = vmax.f32 %v1322_v44, %v1323_v47  ;;  %v1383_v59 = vmul.f32 %v1371_v50, %v1307_v48 }
 0x719   :  { %v1384_v56 = vmul.f32 %v1371_v50, %v1314_v49  ;;  %v1319_v54 = vmax.f32 %v1317_v46, %v1318_v53  ;;  %v1325_v57 = vrot.slane %v1324_v55, 2  ;;  %v1293_v58 = vpop.f32.mrb[20].mxu0 }
 0x71a   :  { %v1329_v60 = vsel %vm1300_vm4, %v1293_v58, -inf  ;;  %v1670_v61 = vpop.f32.mrb[21].mxu0 }
 0x71b   :  { %v1395_v62 = vrot.slane %v1384_v56, 7  ;;  %v1320_v6 = vrot.slane %v1319_v54, 1  ;;  %v1326_v0 = vmax.f32 %v1324_v55, %v1325_v57  ;;  %v1330_v7 = vrot.slane %v1329_v60, 4  ;;  %v1296_v8 = vpop.f32.mrb[22].mxu0 }
 0x71c   :  { %v1336_v2 = vsel %vm1300_vm4, %v1296_v8, -inf  ;;  %v1671_v9 = vpop.f32.mrb[23].mxu0 }
 0x71d   :  { %v1397_v10 = vsel %vm1396_vm5, %v1395_v62, %v1383_v59  ;;  %v1327_v1 = vrot.slane %v1326_v0, 1  ;;  %v1331_v11 = vmax.f32 %v1329_v60, %v1330_v7  ;;  %v1337_v12 = vrot.slane %v1336_v2, 4 }
 0x71e   :  { %v1406_v3 = vsel %vm1405_vm6, %v1397_v10, 0.0  ;;  %v1321_v5 = vmax.f32 %v1319_v54, %v1320_v6 }
 0x71f   :  { %v1328_v13 = vmax.f32 %v1326_v0, %v1327_v1  ;;  %v1332_v14 = vrot.slane %v1331_v11, 2  ;;  %v1338_v15 = vmax.f32 %v1336_v2, %v1337_v12  ;;  %1407 = vadd.xlane.f32.xlu0 %v1406_v3 }
 0x720   :  { %v1385_v25 = vmul.f32 %v1375_v4, %v1321_v5 }
 0x721   :  { %v1333_v17 = vmax.f32 %v1331_v11, %v1332_v14  ;;  %v1339_v18 = vrot.slane %v1338_v15, 2  ;;  %v1386_v21 = vmul.f32 %v1375_v4, %v1328_v13 }
 0x723   :  { %v1334_v23 = vrot.slane %v1333_v17, 1  ;;  %v1340_v24 = vmax.f32 %v1338_v15, %v1339_v18  ;;  %v1398_v52 = vrot.slane %v1386_v21, 7 }
 0x725   :  { %v1341_v28 = vrot.slane %v1340_v24, 1  ;;  %v1399_v29 = vsel %vm1396_vm5, %v1398_v52, %v1385_v25  ;;  %v1335_v31 = vmax.f32 %v1333_v17, %v1334_v23 }
 0x726   :  { %v1409_v30 = vsel %vm1405_vm6, %v1399_v29, 0.0 }
 0x727   :  { %v1342_v19 = vmax.f32 %v1340_v24, %v1341_v28  ;;  %1410 = vadd.xlane.f32.xlu1 %v1409_v30  ;;  %v1387_v32 = vmul.f32 %v1379_v26, %v1335_v31 }
 0x729   :  { %v1388_v20 = vmul.f32 %v1379_v26, %v1342_v19 }
 0x72b   :  { %v1400_v27 = vrot.slane %v1388_v20, 7 }
 0x72d   :  { %v1401_v33 = vsel %vm1396_vm5, %v1400_v27, %v1387_v32 }
 0x72e   :  { %v1412_v34 = vsel %vm1405_vm6, %v1401_v33, 0.0 }
 0x72f   :  { %1413 = vadd.xlane.f32.xlu0 %v1412_v34 }
 0x7ac   :  { %v1408_v36 = vpop.xlane.xlu0 %1407 }
 0x7ad   :  { %v1423_v38 = vrot.slane %v1408_v36, %v2143_v16 }
 0x7b4   :  { %v1411_v35 = vpop.xlane.xlu1 %1410 }
 0x7b5   :  { %v1427_v37 = vrot.slane %v1411_v35, %v2143_v16 }
 0x7b7   :  { %v1432_v40 = vsel %vm1396_vm5, %v1427_v37, %v1423_v38 }
 0x7bc   :  { %v1414_v39 = vpop.xlane.xlu0 %1413 }
 0x7bd   :  { %v1431_v41 = vrot.slane %v1414_v39, %v2143_v16 }
 0x7bf   :  { %v1434_v42 = vsel %vm1433_vm7, %v1431_v41, %v1432_v40 }
 0x7c0   :  { %1437 = vst.msk [vmem:[%s2175_s8] sm:$0x7] %vm1436_vm8, %v1434_v42 }

</bundles_post_ra>
